<compile_context>
chip_gen: v7x
topology: tpu7x:2x2x1
jax: 0.10.0
libtpu: 0.0.40
codegen_flags: <defaults>
</compile_context>

<pallas_src>
import functools

import jax
import jax.numpy as jnp
from jax.experimental import pallas as pl
from jax.experimental.pallas import tpu as pltpu

NORM_EPS = 1e-12                 # F.normalize default eps
BN_EPS = 1e-5                    # BatchNorm3d default eps
_EPS2 = NORM_EPS * NORM_EPS


# --------------------------------------------------------------------------
# generation-aware sizing helpers
# --------------------------------------------------------------------------
def _vmem_budget_bytes():
    """Scoped-VMEM budget: ~75% of physical, capped at 100 MiB, >= 32 MiB."""
    phys = 64 * 1024 * 1024            # v7x has the smallest physical VMEM
    try:
        info = pltpu.get_tpu_info()
        for attr in ("vmem_capacity_bytes", "vmem_bytes", "vmem_size_bytes"):
            v = getattr(info, attr, None)
            if v:
                phys = int(v)
                break
    except Exception:
        pass
    return max(32 * 1024 * 1024, min((phys * 3) // 4, 100 * 1024 * 1024))


def _per_lane_bytes(c, kq):
    """Conservative per-lane VMEM footprint (f32-equivalent) of one N tile:
    double-buffered in/out f32 (4C) + residual/up temp + bf16 x copy (2C)
    + k/kn/q/qn f32 rows and their bf16 copies (~5KQ)."""
    return 4 * (6 * c + 5 * kq)


def _pick_tile_n(n_pad, per_lane, budget):
    """Largest lane-dense (multiple-of-128) divisor of n_pad that fits ~60%
    of the VMEM budget, capped at 32768 lanes."""
    cap = int(budget * 0.6)
    best = 128
    t = 128
    limit = min(n_pad, 32 * 1024)
    while t <= limit:
        if n_pad % t == 0 and t * per_lane <= cap:
            best = t
        t += 128
    return best


# --------------------------------------------------------------------------
# kernels
# --------------------------------------------------------------------------
def _gram_kernel(x_ref, wk_ref, bk_ref, m_ref, *,
                 inv_n, n_valid, tile_n, n_per_split, needs_mask):
    """Pass 1: accumulate M = (1/N) * Kn Kn^T over N tiles (one (split,batch)).

    Grid = (splits, B, n_per_split); the N axis is innermost ("arbitrary") so
    the output block stays resident and we accumulate into it directly.
    """
    ni = pl.program_id(2)

    @pl.when(ni == 0)
    def _():
        m_ref[...] = jnp.zeros_like(m_ref)

    x = x_ref[0]                                               # (C, tn) f32
    # f_key: 1x1x1 conv (+ folded BN)  ==  (KQ, C) @ (C, tn) on the MXU.
    k = jnp.dot(wk_ref[...], x.astype(jnp.bfloat16),
                preferred_element_type=jnp.float32) + bk_ref[...]
    # F.normalize(dim=1): L2 over the channel (sublane) axis, per voxel.
    kn = k * jax.lax.rsqrt(
        jnp.maximum(jnp.sum(k * k, axis=0, keepdims=True), _EPS2))
    kb = kn.astype(jnp.bfloat16)

    if needs_mask:
        start = (pl.program_id(0) * n_per_split + ni) * tile_n
        lane = jax.lax.broadcasted_iota(jnp.int32, (1, tile_n), 1) + start
        kb = jnp.where(lane < n_valid, kb, jnp.zeros_like(kb))

    # Tile contribution to K K^T: contract over the lane (N) axis of both
    # operands directly -- no transpose materialized.
    m_ref[0] += jax.lax.dot_general(
        kb, kb, dimension_numbers=(((1,), (1,)), ((), ())),
        preferred_element_type=jnp.float32)

    @pl.when(ni == pl.num_programs(2) - 1)
    def _():
        m_ref[0] = m_ref[0] * inv_n


def _apply_kernel(x_ref, wq_ref, bq_ref, w2_ref, bupl_ref, o_ref):
    """Pass 2: out = x + W2 @ Qn + bup'  for one N tile (two matmuls)."""
    x = x_ref[0]                                               # (C, tn) f32
    # f_query: 1x1x1 conv (+ folded BN).
    q = jnp.dot(wq_ref[...], x.astype(jnp.bfloat16),
                preferred_element_type=jnp.float32) + bq_ref[...]
    qn = q * jax.lax.rsqrt(
        jnp.maximum(jnp.sum(q * q, axis=0, keepdims=True), _EPS2))
    # W2 = lambda * Wup @ M was precomputed per batch (bf16, (C, KQ)).
    up = jnp.dot(w2_ref[0], qn.astype(jnp.bfloat16),
                 preferred_element_type=jnp.float32)
    o_ref[0] = x + up + bupl_ref[...]


def _fused_kernel(x_ref, wk_ref, bk_ref, wq_ref, bq_ref, wup_ref, bupl_ref,
                  lam_ref, o_ref, *, inv_n, n_valid, needs_mask):
    """Single-pass variant (whole batch's x resident in VMEM): compute M,
    W2 = lambda * Wup @ M, then out = x + W2 @ Qn + bup' from one x read."""
    x = x_ref[0]                                               # (C, N_pad) f32
    xb = x.astype(jnp.bfloat16)

    # --- f_key + Gram matrix -------------------------------------------------
    k = jnp.dot(wk_ref[...], xb,
                preferred_element_type=jnp.float32) + bk_ref[...]
    kn = k * jax.lax.rsqrt(
        jnp.maximum(jnp.sum(k * k, axis=0, keepdims=True), _EPS2))
    kb = kn.astype(jnp.bfloat16)
    if needs_mask:
        lane = jax.lax.broadcasted_iota(jnp.int32, (1, x.shape[-1]), 1)
        kb = jnp.where(lane < n_valid, kb, jnp.zeros_like(kb))
    m = jax.lax.dot_general(
        kb, kb, dimension_numbers=(((1,), (1,)), ((), ())),
        preferred_element_type=jnp.float32) * inv_n            # (KQ, KQ) f32

    # --- W2 = lambda * Wup @ M  (tiny) ---------------------------------------
    w2 = jnp.dot(wup_ref[...], m.astype(jnp.bfloat16),
                 preferred_element_type=jnp.float32) * lam_ref[0]

    # --- f_query + apply + residual ------------------------------------------
    q = jnp.dot(wq_ref[...], xb,
                preferred_element_type=jnp.float32) + bq_ref[...]
    qn = q * jax.lax.rsqrt(
        jnp.maximum(jnp.sum(q * q, axis=0, keepdims=True), _EPS2))
    up = jnp.dot(w2.astype(jnp.bfloat16), qn.astype(jnp.bfloat16),
                 preferred_element_type=jnp.float32)
    o_ref[0] = x + up + bupl_ref[...]


# --------------------------------------------------------------------------
# wrapper
# --------------------------------------------------------------------------
def fau_layer_3d(x_ncdhw, params, *, tile_n=None, gram_splits=None,
                 force_two_pass=False):
    """x_ncdhw: (B, C, T, H, W) float32.  Returns the same shape."""
    B, C, T, H, W = x_ncdhw.shape
    N = T * H * W
    KQ = params["wq"].shape[0]

    # NCDHW -> channels-first (B, C, N): pure reshape, no HBM transpose.
    x = x_ncdhw.reshape(B, C, N)

    # Pad N to a multiple of 128 (lane-dense, unmasked stores); padded lanes
    # are masked out of the Gram sum inside the kernels.
    n_pad = int(pl.cdiv(N, 128)) * 128
    needs_mask = n_pad != N
    if needs_mask:
        x = jnp.pad(x, ((0, 0), (0, 0), (0, n_pad - N)))

    budget = _vmem_budget_bytes()
    per_lane = _per_lane_bytes(C, KQ)

    # bf16 weights for the MXU; biases / accumulation / elementwise stay f32.
    bf = jnp.bfloat16
    wq = params["wq"].astype(bf)
    wk = params["wk"].astype(bf)
    wup = params["wup"].astype(bf)
    lam = params["lam"].astype(jnp.float32).reshape(1)
    bupl = params["bup"] * lam[0]                 # lambda * bup, (C, 1) f32

    use_fused = (not force_two_pass) and (n_pad * per_lane <= int(budget * 0.8))

    if use_fused:
        # ---- single pass: x resident per batch, 2x|x| HBM traffic ----------
        out = pl.pallas_call(
            functools.partial(_fused_kernel, inv_n=1.0 / N, n_valid=N,
                              needs_mask=needs_mask),
            out_shape=jax.ShapeDtypeStruct((B, C, n_pad), jnp.float32),
            grid_spec=pltpu.PrefetchScalarGridSpec(
                num_scalar_prefetch=0,
                grid=(B,),
                in_specs=[
                    pl.BlockSpec((1, C, n_pad), lambda b: (b, 0, 0)),
                    pl.BlockSpec((KQ, C), lambda b: (0, 0)),
                    pl.BlockSpec((KQ, 1), lambda b: (0, 0)),
                    pl.BlockSpec((KQ, C), lambda b: (0, 0)),
                    pl.BlockSpec((KQ, 1), lambda b: (0, 0)),
                    pl.BlockSpec((C, KQ), lambda b: (0, 0)),
                    pl.BlockSpec((C, 1), lambda b: (0, 0)),
                    pl.BlockSpec(memory_space=pltpu.MemorySpace.SMEM),
                ],
                out_specs=pl.BlockSpec((1, C, n_pad), lambda b: (b, 0, 0)),
            ),
            compiler_params=pltpu.CompilerParams(
                dimension_semantics=("parallel",),
                vmem_limit_bytes=budget),
        )(x, wk, params["bk"], wq, params["bq"], wup, bupl, lam)
    else:
        # ---- two passes: tiled over N -------------------------------------
        if tile_n is None:
            tile_n = _pick_tile_n(n_pad, per_lane, budget)
        assert tile_n % 128 == 0 and n_pad % tile_n == 0, \
            "tile_n must be a multiple of 128 dividing the padded N"
        n_tiles = n_pad // tile_n

        # Optional split of the Gram reduction across a leading parallel axis
        # (keeps both v7x TensorCores busy when B gives no parallelism).
        if gram_splits is None:
            gram_splits = 2 if (B == 1 and n_tiles % 2 == 0 and n_tiles >= 2) else 1
        if n_tiles % gram_splits != 0:
            gram_splits = 1
        n_per_split = n_tiles // gram_splits

        # pass 1: per-(split,batch) partial Gram matrices, accumulated in the
        # resident output block; scaled by 1/N on the last N tile.
        m_parts = pl.pallas_call(
            functools.partial(_gram_kernel, inv_n=1.0 / N, n_valid=N,
                              tile_n=tile_n, n_per_split=n_per_split,
                              needs_mask=needs_mask),
            out_shape=jax.ShapeDtypeStruct((gram_splits * B, KQ, KQ),
                                           jnp.float32),
            grid_spec=pltpu.PrefetchScalarGridSpec(
                num_scalar_prefetch=0,
                grid=(gram_splits, B, n_per_split),
                in_specs=[
                    pl.BlockSpec((1, C, tile_n),
                                 lambda s, b, n: (b, 0, s * n_per_split + n)),
                    pl.BlockSpec((KQ, C), lambda s, b, n: (0, 0)),
                    pl.BlockSpec((KQ, 1), lambda s, b, n: (0, 0)),
                ],
                out_specs=pl.BlockSpec((1, KQ, KQ),
                                       lambda s, b, n: (s * B + b, 0, 0)),
            ),
            compiler_params=pltpu.CompilerParams(
                dimension_semantics=("parallel", "parallel", "arbitrary"),
                vmem_limit_bytes=budget),
        )(x, wk, params["bk"])
        m = m_parts.reshape(gram_splits, B, KQ, KQ).sum(axis=0)  # (B, KQ, KQ)

        # W2 = lambda * Wup @ M (tiny per-batch matrix, done once by XLA).
        w2 = (jnp.einsum("oc,bcd->bod", wup, m.astype(bf),
                         preferred_element_type=jnp.float32)
              * lam[0]).astype(bf)                               # (B, C, KQ)

        # pass 2: out = x + W2 @ Qn + lambda*bup, per N tile (2 matmuls).
        out = pl.pallas_call(
            _apply_kernel,
            out_shape=jax.ShapeDtypeStruct((B, C, n_pad), jnp.float32),
            grid_spec=pltpu.PrefetchScalarGridSpec(
                num_scalar_prefetch=0,
                grid=(B, n_tiles),
                in_specs=[
                    pl.BlockSpec((1, C, tile_n), lambda b, n: (b, 0, n)),
                    pl.BlockSpec((KQ, C), lambda b, n: (0, 0)),
                    pl.BlockSpec((KQ, 1), lambda b, n: (0, 0)),
                    pl.BlockSpec((1, C, KQ), lambda b, n: (b, 0, 0)),
                    pl.BlockSpec((C, 1), lambda b, n: (0, 0)),
                ],
                out_specs=pl.BlockSpec((1, C, tile_n), lambda b, n: (b, 0, n)),
            ),
            compiler_params=pltpu.CompilerParams(
                dimension_semantics=("parallel", "parallel"),
                vmem_limit_bytes=budget),
        )(x, wq, params["bq"], w2, bupl)

    if needs_mask:
        out = out[:, :, :N]
    return out.reshape(B, C, T, H, W)


# --------------------------------------------------------------------------
# params + pure-JAX reference (same precision policy => tight check)
# --------------------------------------------------------------------------
def make_params(key, in_channels, kq_channels):
    """Deterministic parameter init; eval-mode BN folded into conv weights.
    Conv3d layers have bias=False, so the only additive term is the folded
    BatchNorm bias (beta - running_mean * scale)."""
    ks = jax.random.split(key, 9)

    def conv_w(k, cout, cin):
        # PyTorch Conv3d weight (cout, cin, 1, 1, 1) -> (cout, cin) matmul form
        return jax.random.normal(k, (cout, cin), jnp.float32) * 0.05

    def bn(kg, kb, c):
        gamma = 1.0 + 0.1 * jax.random.normal(kg, (c,), jnp.float32)
        beta = 0.1 * jax.random.normal(kb, (c,), jnp.float32)
        running_mean = jnp.zeros((c,), jnp.float32)
        running_var = jnp.ones((c,), jnp.float32)
        scale = gamma / jnp.sqrt(running_var + BN_EPS)
        bias = beta - running_mean * scale
        return scale, bias

    wq_raw = conv_w(ks[0], kq_channels, in_channels)
    wk_raw = conv_w(ks[1], kq_channels, in_channels)
    wup_raw = conv_w(ks[2], in_channels, kq_channels)

    sq, bq = bn(ks[3], ks[4], kq_channels)
    sk, bk = bn(ks[5], ks[6], kq_channels)
    sup, bup = bn(ks[7], ks[8], in_channels)

    return {
        "wq": wq_raw * sq[:, None], "bq": bq[:, None],        # (KQ, C), (KQ, 1)
        "wk": wk_raw * sk[:, None], "bk": bk[:, None],        # (KQ, C), (KQ, 1)
        "wup": wup_raw * sup[:, None], "bup": bup[:, None],   # (C, KQ), (C, 1)
        # lambda_ is zeros(1) in the module; non-zero here to exercise the
        # attention branch (lambda=0 identity is checked separately).
        "lam": jnp.array([0.5], jnp.float32),
    }


def fau_layer_3d_ref(x_ncdhw, params):
    """Pure-JAX reference mirroring the kernel's precision policy (bf16 MXU
    operands, f32 accumulation / normalization / residual, W2 fusion)."""
    B, C, T, H, W = x_ncdhw.shape
    N = T * H * W
    bf = jnp.bfloat16
    x = x_ncdhw.reshape(B, C, N)
    xb = x.astype(bf)
    wq = params["wq"].astype(bf)
    wk = params["wk"].astype(bf)
    wup = params["wup"].astype(bf)
    lam = params["lam"][0]

    q = jnp.einsum("oc,bcn->bon", wq, xb,
                   preferred_element_type=jnp.float32) + params["bq"]
    k = jnp.einsum("oc,bcn->bon", wk, xb,
                   preferred_element_type=jnp.float32) + params["bk"]
    q = q * jax.lax.rsqrt(
        jnp.maximum(jnp.sum(q * q, axis=1, keepdims=True), _EPS2))
    k = k * jax.lax.rsqrt(
        jnp.maximum(jnp.sum(k * k, axis=1, keepdims=True), _EPS2))
    kb = k.astype(bf)
    m = jnp.einsum("bcn,bdn->bcd", kb, kb,
                   preferred_element_type=jnp.float32) * (1.0 / N)
    w2 = (jnp.einsum("oc,bcd->bod", wup, m.astype(bf),
                     preferred_element_type=jnp.float32) * lam).astype(bf)
    up = jnp.einsum("bck,bkn->bcn", w2, q.astype(bf),
                    preferred_element_type=jnp.float32)
    out = x + up + params["bup"] * lam
    return out.reshape(B, C, T, H, W)


if __name__ == "__main__":
    B, C, T, H, W = 2, 16, 2, 16, 16     # in_channels = 16, N = T*H*W = 512
    KQ = 32                              # kq_channels

    key = jax.random.PRNGKey(0)
    kx, kp = jax.random.split(key)
    x = jax.random.normal(kx, (B, C, T, H, W), jnp.float32)
    params = make_params(kp, C, KQ)
    ref = jax.block_until_ready(fau_layer_3d_ref(x, params))

    # 1) default path: per-batch x fits VMEM -> single fused pass.
    out = jax.block_until_ready(fau_layer_3d(x, params))
    assert out.shape == (B, C, T, H, W)
    assert jnp.allclose(out, ref, atol=1e-3, rtol=1e-3), "fused pass mismatch"

    # 2) two-pass path: small N tiles + split Gram reduction (v7x-style).
    out2 = jax.block_until_ready(
        fau_layer_3d(x, params, force_two_pass=True, tile_n=128, gram_splits=2))
    assert jnp.allclose(out2, ref, atol=1e-3, rtol=1e-3), "two-pass mismatch"

    # 3) N not a multiple of 128 -> padded lanes masked out of the Gram sum.
    x_odd = jax.random.normal(jax.random.PRNGKey(1), (1, C, 2, 10, 10),
                              jnp.float32)
    ref_odd = jax.block_until_ready(fau_layer_3d_ref(x_odd, params))
    out_odd_fused = jax.block_until_ready(fau_layer_3d(x_odd, params))
    out_odd_2p = jax.block_until_ready(
        fau_layer_3d(x_odd, params, force_two_pass=True, tile_n=128))
    assert jnp.allclose(out_odd_fused, ref_odd, atol=1e-3, rtol=1e-3), \
        "padded fused pass mismatch"
    assert jnp.allclose(out_odd_2p, ref_odd, atol=1e-3, rtol=1e-3), \
        "padded two-pass mismatch"

    # 4) PyTorch default init has lambda_ = 0  =>  the layer is the identity.
    params_id = dict(params, lam=jnp.array([0.0], jnp.float32))
    out_id = jax.block_until_ready(fau_layer_3d(x, params_id))
    assert jnp.allclose(out_id, x), "lambda=0 must reproduce the identity"

    print("KERNEL_OK")
</pallas_src>

<mosaic_0001>
module attributes {stable_mosaic.version = 11 : i64} {
  func.func @_fused_kernel(%arg0: i32, %arg1: memref<1x16x512xf32, #tpu.memory_space<vmem>>, %arg2: memref<32x16xbf16, #tpu.memory_space<vmem>>, %arg3: memref<32x1xf32, #tpu.memory_space<vmem>>, %arg4: memref<32x16xbf16, #tpu.memory_space<vmem>>, %arg5: memref<32x1xf32, #tpu.memory_space<vmem>>, %arg6: memref<16x32xbf16, #tpu.memory_space<vmem>>, %arg7: memref<16x1xf32, #tpu.memory_space<vmem>>, %arg8: memref<1xf32, #tpu.memory_space<smem>>, %arg9: memref<1x16x512xf32, #tpu.memory_space<vmem>>) attributes {dimension_semantics = [#tpu.dimension_semantics<parallel>], iteration_bounds = array<i64: 2>, scalar_prefetch = 0 : i64, scratch_operands = 0 : i64, tpu.core_type = #tpu.core_type<tc>, window_params = [{transform_indices = @transform_0, window_bounds = array<i64: 1, 16, 512>}, {pipeline_mode = #tpu.pipeline_mode<synchronous>, transform_indices = @transform_1, window_bounds = array<i64: 32, 16>}, {pipeline_mode = #tpu.pipeline_mode<synchronous>, transform_indices = @transform_2, window_bounds = array<i64: 32, 1>}, {pipeline_mode = #tpu.pipeline_mode<synchronous>, transform_indices = @transform_3, window_bounds = array<i64: 32, 16>}, {pipeline_mode = #tpu.pipeline_mode<synchronous>, transform_indices = @transform_4, window_bounds = array<i64: 32, 1>}, {pipeline_mode = #tpu.pipeline_mode<synchronous>, transform_indices = @transform_5, window_bounds = array<i64: 16, 32>}, {pipeline_mode = #tpu.pipeline_mode<synchronous>, transform_indices = @transform_6, window_bounds = array<i64: 16, 1>}, {transform_indices = @transform_7, window_bounds = array<i64: 1>}, {transform_indices = @transform_8, window_bounds = array<i64: 1, 16, 512>}]} {
    %c0 = arith.constant 0 : index
    %c0_0 = arith.constant 0 : index
    %c0_1 = arith.constant 0 : index
    %0 = vector.load %arg1[%c0, %c0_0, %c0_1] : memref<1x16x512xf32, #tpu.memory_space<vmem>>, vector<1x16x512xf32>
    %1 = vector.shape_cast %0 : vector<1x16x512xf32> to vector<16x512xf32>
    %2 = arith.truncf %1 : vector<16x512xf32> to vector<16x512xbf16>
    %c0_2 = arith.constant 0 : index
    %c0_3 = arith.constant 0 : index
    %3 = vector.load %arg2[%c0_2, %c0_3] : memref<32x16xbf16, #tpu.memory_space<vmem>>, vector<32x16xbf16>
    %cst = arith.constant dense<0.000000e+00> : vector<32x512xf32>
    %4 = tpu.matmul %3, %2, %cst {dimension_numbers = #tpu.dot_dimension_numbers<[1], [0], [0], [1], [0, 0, 1, 1], [], []>} : vector<32x16xbf16>, vector<16x512xbf16>, vector<32x512xf32> -> vector<32x512xf32>
    %c0_4 = arith.constant 0 : index
    %c0_5 = arith.constant 0 : index
    %5 = vector.load %arg3[%c0_4, %c0_5] : memref<32x1xf32, #tpu.memory_space<vmem>>, vector<32x1xf32>
    %6 = vector.broadcast %5 : vector<32x1xf32> to vector<32x512xf32>
    %7 = arith.addf %4, %6 : vector<32x512xf32>
    %8 = arith.mulf %7, %7 : vector<32x512xf32>
    %cst_6 = arith.constant dense<0.000000e+00> : vector<512xf32>
    %9 = vector.multi_reduction <add>, %8, %cst_6 [0] : vector<32x512xf32> to vector<512xf32>
    %10 = vector.shape_cast %9 : vector<512xf32> to vector<1x512xf32>
    %cst_7 = arith.constant 1.000000e-24 : f32
    %11 = vector.broadcast %cst_7 : f32 to vector<1x512xf32>
    %12 = arith.maximumf %10, %11 : vector<1x512xf32>
    %13 = math.rsqrt %12 : vector<1x512xf32>
    %14 = vector.broadcast %13 : vector<1x512xf32> to vector<32x512xf32>
    %15 = arith.mulf %7, %14 : vector<32x512xf32>
    %16 = arith.truncf %15 : vector<32x512xf32> to vector<32x512xbf16>
    %cst_8 = arith.constant dense<0.000000e+00> : vector<32x32xf32>
    %17 = tpu.matmul %16, %16, %cst_8 {dimension_numbers = #tpu.dot_dimension_numbers<[1], [1], [0], [0], [0, 0, 1, 0], [], []>} : vector<32x512xbf16>, vector<32x512xbf16>, vector<32x32xf32> -> vector<32x32xf32>
    %cst_9 = arith.constant 0.001953125 : f32
    %18 = vector.broadcast %cst_9 : f32 to vector<32x32xf32>
    %19 = arith.mulf %17, %18 : vector<32x32xf32>
    %c0_10 = arith.constant 0 : index
    %c0_11 = arith.constant 0 : index
    %20 = vector.load %arg6[%c0_10, %c0_11] : memref<16x32xbf16, #tpu.memory_space<vmem>>, vector<16x32xbf16>
    %21 = arith.truncf %19 : vector<32x32xf32> to vector<32x32xbf16>
    %cst_12 = arith.constant dense<0.000000e+00> : vector<16x32xf32>
    %22 = tpu.matmul %20, %21, %cst_12 {dimension_numbers = #tpu.dot_dimension_numbers<[1], [0], [0], [1], [0, 0, 1, 1], [], []>} : vector<16x32xbf16>, vector<32x32xbf16>, vector<16x32xf32> -> vector<16x32xf32>
    %c0_13 = arith.constant 0 : index
    %23 = memref.load %arg8[%c0_13] : memref<1xf32, #tpu.memory_space<smem>>
    %24 = vector.broadcast %23 : f32 to vector<16x32xf32>
    %25 = arith.mulf %22, %24 : vector<16x32xf32>
    %c0_14 = arith.constant 0 : index
    %c0_15 = arith.constant 0 : index
    %26 = vector.load %arg4[%c0_14, %c0_15] : memref<32x16xbf16, #tpu.memory_space<vmem>>, vector<32x16xbf16>
    %cst_16 = arith.constant dense<0.000000e+00> : vector<32x512xf32>
    %27 = tpu.matmul %26, %2, %cst_16 {dimension_numbers = #tpu.dot_dimension_numbers<[1], [0], [0], [1], [0, 0, 1, 1], [], []>} : vector<32x16xbf16>, vector<16x512xbf16>, vector<32x512xf32> -> vector<32x512xf32>
    %c0_17 = arith.constant 0 : index
    %c0_18 = arith.constant 0 : index
    %28 = vector.load %arg5[%c0_17, %c0_18] : memref<32x1xf32, #tpu.memory_space<vmem>>, vector<32x1xf32>
    %29 = vector.broadcast %28 : vector<32x1xf32> to vector<32x512xf32>
    %30 = arith.addf %27, %29 : vector<32x512xf32>
    %31 = arith.mulf %30, %30 : vector<32x512xf32>
    %cst_19 = arith.constant dense<0.000000e+00> : vector<512xf32>
    %32 = vector.multi_reduction <add>, %31, %cst_19 [0] : vector<32x512xf32> to vector<512xf32>
    %33 = vector.shape_cast %32 : vector<512xf32> to vector<1x512xf32>
    %cst_20 = arith.constant 1.000000e-24 : f32
    %34 = vector.broadcast %cst_20 : f32 to vector<1x512xf32>
    %35 = arith.maximumf %33, %34 : vector<1x512xf32>
    %36 = math.rsqrt %35 : vector<1x512xf32>
    %37 = vector.broadcast %36 : vector<1x512xf32> to vector<32x512xf32>
    %38 = arith.mulf %30, %37 : vector<32x512xf32>
    %39 = arith.truncf %25 : vector<16x32xf32> to vector<16x32xbf16>
    %40 = arith.truncf %38 : vector<32x512xf32> to vector<32x512xbf16>
    %cst_21 = arith.constant dense<0.000000e+00> : vector<16x512xf32>
    %41 = tpu.matmul %39, %40, %cst_21 {dimension_numbers = #tpu.dot_dimension_numbers<[1], [0], [0], [1], [0, 0, 1, 1], [], []>} : vector<16x32xbf16>, vector<32x512xbf16>, vector<16x512xf32> -> vector<16x512xf32>
    %42 = arith.addf %1, %41 : vector<16x512xf32>
    %c0_22 = arith.constant 0 : index
    %c0_23 = arith.constant 0 : index
    %43 = vector.load %arg7[%c0_22, %c0_23] : memref<16x1xf32, #tpu.memory_space<vmem>>, vector<16x1xf32>
    %44 = vector.broadcast %43 : vector<16x1xf32> to vector<16x512xf32>
    %45 = arith.addf %42, %44 : vector<16x512xf32>
    %c0_24 = arith.constant 0 : index
    %c0_25 = arith.constant 0 : index
    %c0_26 = arith.constant 0 : index
    %46 = vector.load %arg9[%c0_24, %c0_25, %c0_26] : memref<1x16x512xf32, #tpu.memory_space<vmem>>, vector<1x16x512xf32>
    %47 = vector.shape_cast %46 : vector<1x16x512xf32> to vector<16x512xf32>
    %48 = vector.shape_cast %45 : vector<16x512xf32> to vector<1x16x512xf32>
    tpu.vector_store %arg9[%c0_24, %c0_25, %c0_26], %48 {strides = array<i32>} : memref<1x16x512xf32, #tpu.memory_space<vmem>>, vector<1x16x512xf32>,
    return
  }
  func.func @transform_0(%arg0: i32) -> (i32, i32, i32) {
    %c0_i32 = arith.constant 0 : i32
    %c0_i32_0 = arith.constant 0 : i32
    %c0_i32_1 = arith.constant 0 : i32
    return %arg0, %c0_i32, %c0_i32_0 : i32, i32, i32
  }
  func.func @transform_1(%arg0: i32) -> (i32, i32) {
    %c0_i32 = arith.constant 0 : i32
    %c0_i32_0 = arith.constant 0 : i32
    %c0_i32_1 = arith.constant 0 : i32
    return %c0_i32, %c0_i32_0 : i32, i32
  }
  func.func @transform_2(%arg0: i32) -> (i32, i32) {
    %c0_i32 = arith.constant 0 : i32
    %c0_i32_0 = arith.constant 0 : i32
    %c0_i32_1 = arith.constant 0 : i32
    return %c0_i32, %c0_i32_0 : i32, i32
  }
  func.func @transform_3(%arg0: i32) -> (i32, i32) {
    %c0_i32 = arith.constant 0 : i32
    %c0_i32_0 = arith.constant 0 : i32
    %c0_i32_1 = arith.constant 0 : i32
    return %c0_i32, %c0_i32_0 : i32, i32
  }
  func.func @transform_4(%arg0: i32) -> (i32, i32) {
    %c0_i32 = arith.constant 0 : i32
    %c0_i32_0 = arith.constant 0 : i32
    %c0_i32_1 = arith.constant 0 : i32
    return %c0_i32, %c0_i32_0 : i32, i32
  }
  func.func @transform_5(%arg0: i32) -> (i32, i32) {
    %c0_i32 = arith.constant 0 : i32
    %c0_i32_0 = arith.constant 0 : i32
    %c0_i32_1 = arith.constant 0 : i32
    return %c0_i32, %c0_i32_0 : i32, i32
  }
  func.func @transform_6(%arg0: i32) -> (i32, i32) {
    %c0_i32 = arith.constant 0 : i32
    %c0_i32_0 = arith.constant 0 : i32
    %c0_i32_1 = arith.constant 0 : i32
    return %c0_i32, %c0_i32_0 : i32, i32
  }
  func.func @transform_7(%arg0: i32) -> i32 {
    %c0_i32 = arith.constant 0 : i32
    %c0_i32_0 = arith.constant 0 : i32
    return %c0_i32 : i32
  }
  func.func @transform_8(%arg0: i32) -> (i32, i32, i32) {
    %c0_i32 = arith.constant 0 : i32
    %c0_i32_0 = arith.constant 0 : i32
    %c0_i32_1 = arith.constant 0 : i32
    return %arg0, %c0_i32, %c0_i32_0 : i32, i32, i32
  }
}

</mosaic_0001>

<bundles_post_ra>
// kernel: tpu_custom_call.1
= control target key start
LH: loop header
LB: loop body
LE: loop exit
PB: predicated region body
PF: predicated region fallthrough
CT: control target
= control target key end

     0   :  { %s1735_s0 = inlined_call_operand.vmem [shape: f32[2,16,512], index: 0, kind: input, shape index: {}]   ;;  %s1736_s1 = inlined_call_operand.vmem [shape: bf16[32,16], index: 1, kind: input, shape index: {}]   ;;  %s1737_s2 = inlined_call_operand.vmem [shape: f32[32,1], index: 2, kind: input, shape index: {}]   ;;  %s1738_s3 = inlined_call_operand.vmem [shape: bf16[32,16], index: 3, kind: input, shape index: {}]   ;;  %s1739_s4 = inlined_call_operand.vmem [shape: f32[32,1], index: 4, kind: input, shape index: {}]   ;;  %s1740_s5 = inlined_call_operand.vmem [shape: bf16[16,32], index: 5, kind: input, shape index: {}]   ;;  %s1741_s6 = inlined_call_operand.vmem [shape: f32[16,1], index: 6, kind: input, shape index: {}]   ;;  %s1742_s7 = inlined_call_operand.<no memory space> [shape: f32[1], index: 7, kind: input, shape index: {}]   ;;  %s1743_s8 = inlined_call_operand.hbm [shape: f32[2,16,512], index: 8, kind: output, shape index: {}]  }
   0x1   :  { %13 = sst [smem:[#allocation2]] %s1742_s7 }
   0x2   :  { %14 = vsyncpa [#allocation4], 0 }
   0x3   :  { %16 = vsyncpa [#allocation4 + $0x1], 0  ;;  %s1383_s29 = smov 0   ;;  %s1385_s30 = smov 0  }
   0x4   :  { %s1387_s9 = smov 0   ;;  %s1389_s10 = smov 0  }
   0x5 LB: > { %s1404_s7 = sadd.s32 4294967295, %s1327_s10   ;;  %s1149_s11 = sadd.s32 4294967294, %s1327_s10   ;;  %s1327_s10 = sphi %s1389_s10, %s1749_s10   ;;  %s1323_s9 = sphi %s1387_s9, %s1748_s9   ;;  %s1319_s30 = sphi %s1385_s30, %s1747_s30   ;;  %s1315_s29 = sphi %s1383_s29, %s1746_s29  }
   0x6   : > { %s1408_s12 = sadd.s32 1, %s1327_s10   ;;  %s202_s13 = sadd.s32 1, %s1323_s9 }
   0x7   : > { %s199_s14 = ssub.s32 %s1327_s10, %s1408_s12  ;;  %p212_p0 = scmp.ne.s32.totalorder %s1323_s9, %s1319_s30 }
   0x8   : > { %p200_p1 = scmp.eq.s32.totalorder %s199_s14, 0  ;;  %p213_p2 = scmp.eq.s32.totalorder %s1404_s7, 1 }
   0x9   : > { %p218_p3 = scmp.ne.s32.totalorder %s1319_s30, %s1315_s29  ;;  %p219_p4 = scmp.eq.s32.totalorder %s1149_s11, 1 }
   0xa   : > { %s1419_s15 = scalar_select %p200_p1, %s1323_s9, %s202_s13  }
   0xb   : > { %p1421_p5 = por %p213_p2, %p212_p0  ;;  %p1425_p6 = por %p219_p4, %p218_p3 }
   0xc   : > { %p1152_p7 = scmp.ge.s32.totalorder %s1327_s10, 1  ;;  %p266_p8 = scmp.lt.s32.totalorder %s1327_s10, 3 }
   0xe   : > { %p267_p9 = pnand %p1152_p7, %p266_p8 }
   0xf   : > { %p300_p10 = scmp.lt.s32.totalorder (!%p267_p9), %s1404_s7, 1  ;;  %v1329_v0 = vmov (!%p267_p9), 0   ;;  %v322_v1 = vld [vmem:[%s1737_s2] sm:$0xff] (!%p267_p9)  ;;  %v324_v2 = vld [vmem:[%s1737_s2 + $0x10] sm:$0xff] (!%p267_p9)  ;;  %v323_v3 = vld [vmem:[%s1737_s2 + $0x8] sm:$0xff] (!%p267_p9)  ;;  %vm356_vm0 = vcmask (!%p267_p9), 130048  }
  0x10   : > { %270 = sbr.rel (%p267_p9) target bundleno = 1079 (0x437), region = 52  ;;  %395 = vmatprep.mubr.bf16.mxu0 (!%p267_p9), %v1329_v0  ;;  %448 = vmatprep.mubr.bf16.mxu1 (!%p267_p9), %v1329_v0  ;;  %v325_v4 = vld [vmem:[%s1737_s2 + $0x18] sm:$0xff] (!%p267_p9)  ;;  %v717_v8 = vld [vmem:[%s1739_s4] sm:$0xff] (!%p267_p9)  ;;  %v718_v14 = vld [vmem:[%s1739_s4 + $0x8] sm:$0xff] (!%p267_p9)  ;;  %vm1331_vm1 = vmmov (!%p267_p9), 0   ;;  %vm664_vm2 = vcmask (!%p267_p9), 261120  }
  0x11   : > { %1242 = vset.pattern.permute.xlu0 (!%p267_p9), %v1329_v0  ;;  %1243 = vset.pattern.permute.xlu1 (!%p267_p9), %v1329_v0  ;;  %v1244_v13 = vld [vmem:[%s1736_s1] sm:$0xff] (!%p267_p9)   ;;  %v719_v20 = vld [vmem:[%s1739_s4 + $0x10] sm:$0xff] (!%p267_p9)  ;;  %v720_v21 = vld [vmem:[%s1739_s4 + $0x18] sm:$0xff] (!%p267_p9)  ;;  %s709_s25 = sld [smem:[#allocation2]] (!%p267_p9)  ;;  %s297_s26 = sand.u32 (!%p267_p9), 1, %s1319_s30  }
  0x12   : > { %328 = vperm.xlu0 (!%p267_p9), %1242, %v322_v1   ;;  %338 = vperm.xlu1 (!%p267_p9), %1243, %v324_v2   ;;  %v1045_v22 = vld [vmem:[%s1741_s6] sm:$0xff] (!%p267_p9)  ;;  %v1245_v23 = vld [vmem:[%s1736_s1 + $0x8] sm:$0xff] (!%p267_p9)   ;;  %s1153_s27 = sshll.u32 (!%p267_p9), %s297_s26, 6  ;;  %s1178_s11 = sshll.u32 (!%p267_p9), %s1404_s7, 10 }
  0x13   : > { %v1046_v24 = vld [vmem:[%s1741_s6 + $0x8] sm:$0xff] (!%p267_p9)  ;;  %s299_s28 = scalar_lea.vmem (!%p267_p9), [#allocation3], %s1153_s27  ;;  %s1688_s19 = scalar_lea.hbm (!%p267_p9), %s1743_s8, %s1178_s11 }
  0x14   : > { %s1332_s21 = smov (!%p267_p9), [#allocation3]  }
  0x15   : > { %s1269_s22 = sshll.u32 (!%p267_p9), %s1332_s21, 4  ;;  %s1270_s22 = int_to_ptr.vmem [resolvable:$false] %s1269_s22 }
  0x16   : > { %333 = vperm.xlu0 (!%p267_p9), %1242, %v323_v3   ;;  %343 = vperm.xlu1 (!%p267_p9), %1243, %v325_v4  }
  0x17   : > { %s301_s18 = scalar_select %p300_p10, %s1404_s7, 1 }
  0x18   : > { %s1694_s7 = scalar_lea.sflag [#allocation4], %s297_s26 }
  0x19   : > { %s1177_s23 = sshll.u32 %s301_s18, 6 }
  0x1a   : > { %s304_s13 = scalar_lea.vmem %s1735_s0, %s1177_s23  ;;  %723 = vperm.xlu0 %1242, %v717_v8   ;;  %728 = vperm.xlu1 %1243, %v718_v14   ;;  %s1271_s23 = scalar_lea.vmem %s1270_s22, 2048 }
  0x1b   : > { %v1452_v5 = vld [vmem:[%s304_s13 + $0x8] sm:$0xff]  ;;  %v1456_v7 = vld [vmem:[%s304_s13 + $0x18] sm:$0xff]  ;;  %v1467_v11 = vld [vmem:[%s304_s13] sm:$0xff] }
  0x1c   : > { %v1454_v6 = vld [vmem:[%s304_s13 + $0x28] sm:$0xff]  ;;  %v1465_v10 = vld [vmem:[%s304_s13 + $0x38] sm:$0xff]  ;;  %v1469_v12 = vld [vmem:[%s304_s13 + $0x20] sm:$0xff] }
  0x1d   : > { %v1463_v9 = vpack.c.bf16 %v1454_v6, %v1452_v5  ;;  %v1479_v15 = vpack.c.bf16 %v1465_v10, %v1456_v7  ;;  %v1483_v16 = vpack.c.bf16 %v1469_v12, %v1467_v11  ;;  %v1485_v17 = vld [vmem:[%s304_s13 + $0x10] sm:$0xff] }
  0x1e   : > { %v1487_v18 = vld [vmem:[%s304_s13 + $0x30] sm:$0xff]  ;;  %733 = vperm.xlu0 %1242, %v719_v20   ;;  %738 = vperm.xlu1 %1243, %v720_v21   ;;  %s1087_s13 = sshll.u32 %s299_s28, 4  ;;  %s1690_s13 = int_to_ptr.vmem [resolvable:$true] %s1087_s13 }
  0x1f   : > { %363 = vmatprep.subr.bf16.mxu0 %v1463_v9  ;;  %v1492_v19 = vpack.c.bf16 %v1487_v18, %v1485_v17  ;;  %416 = vmatprep.subr.bf16.mxu1 %v1479_v15  ;;  %s1265_s20 = scalar_lea.vmem %s1690_s13, 1024  ;;  %p1272_p0 = scmp.lt.s32.totalorder %s1690_s13, %s1270_s22 }
  0x20   : > { %364 = vmatpush1.bf16.msra.mxu0 %v1483_v16  ;;  %p1266_p11 = scmp.ne.s32.totalorder %s1690_s13, %s1265_s20  ;;  %p1273_p1 = scmp.lt.s32.totalorder %s1271_s23, %s1265_s20 }
  0x21   : > { %417 = vmatpush1.bf16.msra.mxu1 %v1492_v19 }
  0x22   : > { %1049 = vperm.xlu0 %1242, %v1045_v22   ;;  %1054 = vperm.xlu1 %1243, %v1046_v24   ;;  %p1267_p12 = pnand %p1266_p11, %p1421_p5  ;;  %p1274_p2 = por %p1273_p1, %p1272_p0 }
  0x23   : > { %1158 = vmatmul.mubr.msk.bf16.vlgmr.msra.gmra.mrb[0].mxu0 %vm356_vm0, %v1244_v13 }
  0x24   : > { %1160 = vmatmul.mubr.msk.bf16.vlgmr.msra.gmra.mrb[0].mxu1 %vm356_vm0, %v1244_v13  ;;  %405 = vmatprep.mubr.bf16.mxu0 %v1329_v0  ;;  %p1268_p13 = pneg %p1267_p12 }
  0x25   : > { %458 = vmatprep.mubr.bf16.mxu1 %v1329_v0 }
  0x26   : > { %p1275_p3 = pnand %p1274_p2, %p1268_p13 }
  0x2b   : > { %1159 = vmatmul.mubr.msk.bf16.gmra.mrb[4].mxu0 %vm356_vm0, %v1245_v23 }
  0x2c   : > { %1161 = vmatmul.mubr.msk.bf16.gmra.mrb[4].mxu1 %vm356_vm0, %v1245_v23 }
  0x91   : > { %v329_v25 = vpop.permute.xlu0 %328  ;;  %v339_v26 = vpop.permute.xlu1 %338 }
  0x95   : > { %v334_v27 = vpop.permute.xlu0 %333  ;;  %v344_v53 = vpop.permute.xlu1 %343 }
  0xf6   : > { %v397_v28 = vpop.f32.mrb[0].mxu0 }
  0xf7   : > { %v1518_v29 = vadd.f32 %v397_v28, %v329_v25  ;;  %v450_v30 = vpop.f32.mrb[0].mxu1  ;;  %v399_v31 = vpop.f32.mrb[1].mxu0 }
  0xf8   : > { %v1520_v32 = vadd.f32 %v450_v30, %v329_v25  ;;  %v1522_v33 = vadd.f32 %v399_v31, %v329_v25  ;;  %v452_v34 = vpop.f32.mrb[1].mxu1  ;;  %v401_v35 = vpop.f32.mrb[2].mxu0 }
  0xf9   : > { %v1524_v36 = vadd.f32 %v452_v34, %v329_v25  ;;  %v1526_v37 = vadd.f32 %v401_v35, %v334_v27  ;;  %v454_v38 = vpop.f32.mrb[2].mxu1  ;;  %v403_v39 = vpop.f32.mrb[3].mxu0  ;;  %v469_v44 = vmul.f32 %v1518_v29, %v1518_v29 }
  0xfa   : > { %v471_v40 = vmul.f32 %v1520_v32, %v1520_v32  ;;  %v1530_v41 = vadd.f32 %v454_v38, %v334_v27  ;;  %v1532_v42 = vadd.f32 %v403_v39, %v334_v27  ;;  %v456_v43 = vpop.f32.mrb[3].mxu1  ;;  %v470_v48 = vmul.f32 %v1522_v33, %v1522_v33 }
  0xfb   : > { %v472_v45 = vmul.f32 %v1524_v36, %v1524_v36  ;;  %v473_v46 = vmul.f32 %v1526_v37, %v1526_v37  ;;  %v1540_v47 = vadd.f32 %v456_v43, %v334_v27 }
  0xfc   : > { %v475_v49 = vmul.f32 %v1530_v41, %v1530_v41  ;;  %v474_v50 = vmul.f32 %v1532_v42, %v1532_v42 }
  0xfd   : > { %v485_v51 = vadd.f32 %v473_v46, %v469_v44  ;;  %v476_v52 = vmul.f32 %v1540_v47, %v1540_v47 }
  0xfe   : > { %v503_v54 = vadd.f32 %v475_v49, %v471_v40  ;;  %v494_v55 = vadd.f32 %v474_v50, %v470_v48  ;;  %v407_v56 = vpop.f32.mrb[4].mxu0 }
  0xff   : > { %v512_v57 = vadd.f32 %v476_v52, %v472_v45  ;;  %v1550_v58 = vadd.f32 %v407_v56, %v339_v26  ;;  %v460_v59 = vpop.f32.mrb[4].mxu1  ;;  %v409_v60 = vpop.f32.mrb[5].mxu0 }
 0x100   : > { %v1552_v61 = vadd.f32 %v460_v59, %v339_v26  ;;  %v1554_v62 = vadd.f32 %v409_v60, %v339_v26  ;;  %v462_v63 = vpop.f32.mrb[5].mxu1  ;;  %v411_v1 = vpop.f32.mrb[6].mxu0 }
 0x101   : > { %v477_v2 = vmul.f32 %v1550_v58, %v1550_v58  ;;  %v1558_v3 = vadd.f32 %v462_v63, %v339_v26  ;;  %v412_v4 = vadd.f32 %v411_v1, %v344_v53  ;;  %v464_v8 = vpop.f32.mrb[6].mxu1  ;;  %v413_v13 = vpop.f32.mrb[7].mxu0 }
 0x102   : > { %v479_v14 = vmul.f32 %v1552_v61, %v1552_v61  ;;  %v478_v20 = vmul.f32 %v1554_v62, %v1554_v62  ;;  %v465_v21 = vadd.f32 %v464_v8, %v344_v53  ;;  %v414_v22 = vadd.f32 %v413_v13, %v344_v53  ;;  %v466_v23 = vpop.f32.mrb[7].mxu1 }
 0x103   : > { %v486_v24 = vadd.f32 %v485_v51, %v477_v2  ;;  %v480_v25 = vmul.f32 %v1558_v3, %v1558_v3  ;;  %v481_v27 = vmul.f32 %v412_v4, %v412_v4  ;;  %v467_v28 = vadd.f32 %v466_v23, %v344_v53 }
 0x104   : > { %v504_v26 = vadd.f32 %v503_v54, %v479_v14  ;;  %v495_v30 = vadd.f32 %v494_v55, %v478_v20  ;;  %v483_v31 = vmul.f32 %v465_v21, %v465_v21  ;;  %v482_v34 = vmul.f32 %v414_v22, %v414_v22 }
 0x105   : > { %v513_v35 = vadd.f32 %v512_v57, %v480_v25  ;;  %v487_v38 = vadd.f32 %v486_v24, %v481_v27  ;;  %v484_v39 = vmul.f32 %v467_v28, %v467_v28 }
 0x106   : > { %v505_v40 = vadd.f32 %v504_v26, %v483_v31  ;;  %v496_v43 = vadd.f32 %v495_v30, %v482_v34 }
 0x107   : > { %v488_v44 = vrot.slane %v487_v38, 4  ;;  %v514_v45 = vadd.f32 %v513_v35, %v484_v39 }
 0x108   : > { %v506_v46 = vrot.slane %v505_v40, 4  ;;  %v497_v48 = vrot.slane %v496_v43, 4 }
 0x109   : > { %v489_v49 = vadd.f32 %v488_v44, %v487_v38  ;;  %v515_v50 = vrot.slane %v514_v45, 4 }
 0x10a   : > { %v507_v51 = vadd.f32 %v506_v46, %v505_v40  ;;  %v498_v52 = vadd.f32 %v497_v48, %v496_v43 }
 0x10b   : > { %v490_v56 = vrot.slane %v489_v49, 2  ;;  %v516_v59 = vadd.f32 %v515_v50, %v514_v45 }
 0x10c   : > { %v508_v53 = vrot.slane %v507_v51, 2  ;;  %v499_v54 = vrot.slane %v498_v52, 2 }
 0x10d   : > { %v491_v55 = vadd.f32 %v490_v56, %v489_v49  ;;  %v517_v60 = vrot.slane %v516_v59, 2 }
 0x10e   : > { %v509_v63 = vadd.f32 %v508_v53, %v507_v51  ;;  %v500_v57 = vadd.f32 %v499_v54, %v498_v52 }
 0x10f   : > { %v492_v1 = vrot.slane %v491_v55, 1  ;;  %v518_v2 = vadd.f32 %v517_v60, %v516_v59 }
 0x110   : > { %v510_v8 = vrot.slane %v509_v63, 1  ;;  %v501_v13 = vrot.slane %v500_v57, 1 }
 0x111   : > { %v493_v14 = vadd.f32 %v492_v1, %v491_v55  ;;  %v519_v20 = vrot.slane %v518_v2, 1 }
 0x112   : > { %v511_v23 = vadd.f32 %v510_v8, %v509_v63  ;;  %v502_v24 = vadd.f32 %v501_v13, %v500_v57 }
 0x113   : > { %v521_v25 = vmax.f32 %v493_v14, 1e-24  ;;  %v520_v27 = vadd.f32 %v519_v20, %v518_v2  ;;  %v1246_v20 = vld [vmem:[%s1740_s5] sm:$0xff]  }
 0x114   : > { %v523_v26 = vmax.f32 %v511_v23, 1e-24  ;;  %v522_v30 = vmax.f32 %v502_v24, 1e-24  ;;  %v1247_v23 = vld [vmem:[%s1738_s3] sm:$0xff]  }
 0x115   : > { %1249 = vrsqrt.f32 %v521_v25  ;;  %v524_v31 = vmax.f32 %v520_v27, 1e-24 }
 0x116   : > { %1251 = vrsqrt.f32 %v523_v26 }
 0x117   : > { %1253 = vrsqrt.f32 %v522_v30 }
 0x118   : > { %1255 = vrsqrt.f32 %v524_v31  ;;  %v724_v31 = vpop.permute.xlu0 %723 }
 0x11f   : > { %v1250_v34 = vpop.eup %1249 }
 0x120   : > { %v1252_v35 = vpop.eup %1251  ;;  %v537_v38 = vmul.f32 %v1250_v34, %v1550_v58  ;;  %v541_v39 = vmul.f32 %v1250_v34, %v412_v4  ;;  %v529_v40 = vmul.f32 %v1250_v34, %v1518_v29  ;;  %v533_v43 = vmul.f32 %v1250_v34, %v1526_v37 }
 0x121   : > { %v1254_v44 = vpop.eup %1253  ;;  %v539_v45 = vmul.f32 %v1252_v35, %v1552_v61  ;;  %v543_v46 = vmul.f32 %v1252_v35, %v465_v21  ;;  %v531_v48 = vmul.f32 %v1252_v35, %v1520_v32  ;;  %v535_v49 = vmul.f32 %v1252_v35, %v1530_v41 }
 0x122   : > { %v1256_v50 = vpop.eup %1255  ;;  %v549_v51 = vpack.c.bf16 %v541_v39, %v537_v38  ;;  %v542_v52 = vmul.f32 %v1254_v44, %v414_v22  ;;  %v530_v56 = vmul.f32 %v1254_v44, %v1522_v33  ;;  %v534_v58 = vmul.f32 %v1254_v44, %v1532_v42  ;;  %v729_v39 = vpop.permute.xlu1 %728 }
 0x123   : > { %v551_v4 = vpack.c.bf16 %v543_v46, %v539_v45  ;;  %v544_v59 = vmul.f32 %v1256_v50, %v467_v28  ;;  %v545_v29 = vpack.c.bf16 %v533_v43, %v529_v40  ;;  %v538_v37 = vmul.f32 %v1254_v44, %v1554_v62 }
 0x124   : > { %v546_v53 = vpack.c.bf16 %v534_v58, %v530_v56  ;;  %v532_v61 = vmul.f32 %v1256_v50, %v1524_v36  ;;  %v536_v21 = vmul.f32 %v1256_v50, %v1540_v47  ;;  %v547_v32 = vpack.c.bf16 %v535_v49, %v531_v48  ;;  %v734_v56 = vpop.permute.xlu0 %733 }
 0x125   : > { %v550_v54 = vpack.c.bf16 %v542_v52, %v538_v37  ;;  %v540_v41 = vmul.f32 %v1256_v50, %v1558_v3  ;;  %v1330_v36 = vmov 0.0  }
 0x126   : > { %553 = vmatprep.subr.bf16.mxu0 %v546_v53  ;;  %585 = vmatprep.mubr.bf16.mxu0 %v546_v53  ;;  %v548_v22 = vpack.c.bf16 %v536_v21, %v532_v61  ;;  %v739_v37 = vpop.permute.xlu1 %738 }
 0x127   : > { %554 = vmatpush1.bf16.xpose.msra.mxu0 %v545_v29  ;;  %v552_v33 = vpack.c.bf16 %v544_v59, %v540_v41  ;;  %1182 = vmatprep.subr.bf16.mxu1 %v1330_v36 }
 0x128   : > { %555 = vmatprep.subr.bf16.mxu0 %v550_v54  ;;  %1186 = vmatprep.mubr.msk.bf16.mxu1 %vm1331_vm1, %v1330_v36 }
 0x12f   : > { %556 = vmatpush1.bf16.xpose.msra.mxu0 %v549_v51 }
 0x130   : > { %602 = vmatprep.subr.bf16.mxu0 %v548_v22 }
 0x136   : > { %586 = vmatmul.mubr.bf16.vlgmr.msra.gmra.mrb[8].mxu0 %v545_v29 }
 0x137   : > { %593 = vmatprep.mubr.bf16.mxu0 %v550_v54  ;;  %603 = vmatpush1.bf16.xpose.msra.mxu0 %v547_v32 }
 0x138   : > { %604 = vmatprep.subr.bf16.mxu0 %v552_v33 }
 0x13e   : > { %594 = vmatmul.mubr.bf16.gmra.mrb[12].mxu0 %v549_v51 }
 0x13f   : > { %605 = vmatpush1.bf16.xpose.msra.mxu0 %v551_v4  ;;  %634 = vmatprep.mubr.bf16.mxu0 %v548_v22 }
 0x146   : > { %635 = vmatmul.mubr.bf16.vlgmr.msra.gmra.mrb[8].mxu0 %v547_v32 }
 0x147   : > { %642 = vmatprep.mubr.bf16.mxu0 %v552_v33 }
 0x14e   : > { %643 = vmatmul.mubr.bf16.gmra.mrb[12].mxu0 %v551_v4 }
 0x14f   : > { %983 = vmatprep.mubr.bf16.mxu0 %v1329_v0 }
 0x219   : > { %v636_v42 = vpop.f32.mrb[8].mxu0 }
 0x21a   : > { %v638_v47 = vpop.f32.mrb[9].mxu0  ;;  %v651_v3 = vmul.f32 0.001953125, %v636_v42 }
 0x21b   : > { %v639_v62 = vpop.f32.mrb[10].mxu0 }
 0x21c   : > { %v652_v28 = vmul.f32 0.001953125, %v639_v62  ;;  %v641_v55 = vpop.f32.mrb[11].mxu0 }
 0x21e   : > { %v657_v60 = vpack.c.bf16 %v652_v28, %v651_v3 }
 0x220   : > { %1183 = vmatpush3.bf16.msra.mxu1 %v657_v60 }
 0x221   : > { %v644_v63 = vpop.f32.mrb[12].mxu0  ;;  %1184 = vmatprep.subr.bf16.mxu1 %v1330_v36 }
 0x222   : > { %v646_v57 = vpop.f32.mrb[13].mxu0  ;;  %v653_v2 = vmul.f32 0.001953125, %v644_v63 }
 0x223   : > { %v647_v1 = vpop.f32.mrb[14].mxu0 }
 0x224   : > { %v654_v8 = vmul.f32 0.001953125, %v647_v1  ;;  %v649_v13 = vpop.f32.mrb[15].mxu0 }
 0x226   : > { %v658_v14 = vpack.c.bf16 %v654_v8, %v653_v2 }
 0x228   : > { %1185 = vmatpush3.bf16.msra.mxu1 %v658_v14 }
 0x229   : > { %757 = vmatprep.subr.bf16.mxu1 %v1463_v9  ;;  %v1248_v9 = vld [vmem:[%s1738_s3 + $0x8] sm:$0xff]  }
 0x22b   : > { %1187 = vmatmul.mubr.msk.bf16.vlgmr.msra.gmra.mrb[8].mxu1 %vm664_vm2, %v1246_v20 }
 0x22c   : > { %758 = vmatpush1.bf16.msra.mxu1 %v1483_v16  ;;  %789 = vmatprep.mubr.bf16.mxu1 %v1329_v0  ;;  %v710_v16 = vstv %s709_s25 }
 0x22d   : > { %810 = vmatprep.subr.bf16.mxu1 %v1479_v15 }
 0x233   : > { %1166 = vmatmul.mubr.msk.bf16.vlgmr.msra.gmra.mrb[12].mxu1 %vm356_vm0, %v1247_v23 }
 0x234   : > { %811 = vmatpush1.bf16.msra.mxu1 %v1492_v19  ;;  %799 = vmatprep.mubr.bf16.mxu1 %v1329_v0 }
 0x23b   : > { %1167 = vmatmul.mubr.msk.bf16.gmra.mrb[16].mxu1 %vm356_vm0, %v1248_v9 }
 0x23c   : > { %842 = vmatprep.mubr.bf16.mxu1 %v1329_v0 }
 0x243   : > { %1168 = vmatmul.mubr.msk.bf16.vlgmr.msra.gmra.mrb[20].mxu1 %vm356_vm0, %v1247_v23 }
 0x244   : > { %852 = vmatprep.mubr.bf16.mxu1 %v1329_v0 }
 0x24b   : > { %1169 = vmatmul.mubr.msk.bf16.gmra.mrb[24].mxu1 %vm356_vm0, %v1248_v9 }
 0x2fe   : > { %v702_v15 = vpop.f32.mrb[8].mxu1 }
 0x2ff   : > { %v1188_v19 = vpop.f32.mrb[9].mxu1  ;;  %v711_v25 = vmul.f32 %v710_v16, %v702_v15 }
 0x300   : > { %v705_v24 = vpop.f32.mrb[10].mxu1 }
 0x301   : > { %v712_v27 = vmul.f32 %v710_v16, %v705_v24  ;;  %v1189_v26 = vpop.f32.mrb[11].mxu1 }
 0x303   : > { %v1601_v30 = vpack.c.bf16 %v712_v27, %v711_v25 }
 0x306   : > { %v791_v34 = vpop.f32.mrb[12].mxu1 }
 0x307   : > { %v1603_v35 = vadd.f32 %v791_v34, %v724_v31  ;;  %v793_v38 = vpop.f32.mrb[13].mxu1 }
 0x308   : > { %v1605_v40 = vadd.f32 %v793_v38, %v724_v31  ;;  %v795_v43 = vpop.f32.mrb[14].mxu1 }
 0x309   : > { %v1607_v44 = vadd.f32 %v795_v43, %v729_v39  ;;  %v797_v45 = vpop.f32.mrb[15].mxu1  ;;  %v863_v48 = vmul.f32 %v1603_v35, %v1603_v35 }
 0x30a   : > { %v1609_v46 = vadd.f32 %v797_v45, %v729_v39  ;;  %v864_v50 = vmul.f32 %v1605_v40, %v1605_v40 }
 0x30b   : > { %v867_v49 = vmul.f32 %v1607_v44, %v1607_v44 }
 0x30c   : > { %v868_v51 = vmul.f32 %v1609_v46, %v1609_v46 }
 0x30d   : > { %v879_v52 = vadd.f32 %v867_v49, %v863_v48 }
 0x30e   : > { %v888_v58 = vadd.f32 %v868_v51, %v864_v50  ;;  %v801_v4 = vpop.f32.mrb[16].mxu1 }
 0x30f   : > { %v1619_v59 = vadd.f32 %v801_v4, %v734_v56  ;;  %v803_v29 = vpop.f32.mrb[17].mxu1 }
 0x310   : > { %v1621_v53 = vadd.f32 %v803_v29, %v734_v56  ;;  %v805_v61 = vpop.f32.mrb[18].mxu1 }
 0x311   : > { %v871_v21 = vmul.f32 %v1619_v59, %v1619_v59  ;;  %v1625_v32 = vadd.f32 %v805_v61, %v739_v37  ;;  %v807_v54 = vpop.f32.mrb[19].mxu1 }
 0x312   : > { %v872_v41 = vmul.f32 %v1621_v53, %v1621_v53  ;;  %v1629_v22 = vadd.f32 %v807_v54, %v739_v37 }
 0x313   : > { %v880_v33 = vadd.f32 %v879_v52, %v871_v21  ;;  %v875_v36 = vmul.f32 %v1625_v32, %v1625_v32 }
 0x314   : > { %v889_v42 = vadd.f32 %v888_v58, %v872_v41  ;;  %v876_v47 = vmul.f32 %v1629_v22, %v1629_v22 }
 0x315   : > { %v881_v62 = vadd.f32 %v880_v33, %v875_v36 }
 0x316   : > { %v890_v3 = vadd.f32 %v889_v42, %v876_v47  ;;  %v844_v28 = vpop.f32.mrb[20].mxu1 }
 0x317   : > { %v882_v55 = vrot.slane %v881_v62, 4  ;;  %v1635_v60 = vadd.f32 %v844_v28, %v724_v31  ;;  %v846_v63 = vpop.f32.mrb[21].mxu1 }
 0x318   : > { %v891_v57 = vrot.slane %v890_v3, 4  ;;  %v1637_v1 = vadd.f32 %v846_v63, %v724_v31  ;;  %v848_v2 = vpop.f32.mrb[22].mxu1 }
 0x319   : > { %v883_v8 = vadd.f32 %v882_v55, %v881_v62  ;;  %v1639_v13 = vadd.f32 %v848_v2, %v729_v39  ;;  %v850_v14 = vpop.f32.mrb[23].mxu1  ;;  %v865_v15 = vmul.f32 %v1635_v60, %v1635_v60 }
 0x31a   : > { %v892_v20 = vadd.f32 %v891_v57, %v890_v3  ;;  %v1641_v23 = vadd.f32 %v850_v14, %v729_v39  ;;  %v866_v24 = vmul.f32 %v1637_v1, %v1637_v1 }
 0x31b   : > { %v884_v9 = vrot.slane %v883_v8, 2  ;;  %v869_v16 = vmul.f32 %v1639_v13, %v1639_v13 }
 0x31c   : > { %v893_v19 = vrot.slane %v892_v20, 2  ;;  %v870_v25 = vmul.f32 %v1641_v23, %v1641_v23 }
 0x31d   : > { %v885_v27 = vadd.f32 %v884_v9, %v883_v8  ;;  %v897_v26 = vadd.f32 %v869_v16, %v865_v15 }
 0x31e   : > { %v894_v31 = vadd.f32 %v893_v19, %v892_v20  ;;  %v906_v34 = vadd.f32 %v870_v25, %v866_v24  ;;  %v854_v38 = vpop.f32.mrb[24].mxu1 }
 0x31f   : > { %v886_v39 = vrot.slane %v885_v27, 1  ;;  %v855_v43 = vadd.f32 %v854_v38, %v734_v56  ;;  %v856_v45 = vpop.f32.mrb[25].mxu1 }
 0x320   : > { %v895_v48 = vrot.slane %v894_v31, 1  ;;  %v1651_v49 = vadd.f32 %v856_v45, %v734_v56  ;;  %v858_v50 = vpop.f32.mrb[26].mxu1 }
 0x321   : > { %v887_v51 = vadd.f32 %v886_v39, %v885_v27  ;;  %v873_v52 = vmul.f32 %v855_v43, %v855_v43  ;;  %v859_v58 = vadd.f32 %v858_v50, %v739_v37  ;;  %v860_v4 = vpop.f32.mrb[27].mxu1 }
 0x322   : > { %v896_v29 = vadd.f32 %v895_v48, %v894_v31  ;;  %v874_v61 = vmul.f32 %v1651_v49, %v1651_v49  ;;  %v861_v21 = vadd.f32 %v860_v4, %v739_v37 }
 0x323   : > { %v915_v54 = vmax.f32 %v887_v51, 1e-24  ;;  %v898_v41 = vadd.f32 %v897_v26, %v873_v52  ;;  %v877_v33 = vmul.f32 %v859_v58, %v859_v58 }
 0x324   : > { %v916_v36 = vmax.f32 %v896_v29, 1e-24  ;;  %v907_v42 = vadd.f32 %v906_v34, %v874_v61  ;;  %v878_v47 = vmul.f32 %v861_v21, %v861_v21 }
 0x325   : > { %1257 = vrsqrt.f32 %v915_v54  ;;  %v899_v62 = vadd.f32 %v898_v41, %v877_v33 }
 0x326   : > { %1259 = vrsqrt.f32 %v916_v36  ;;  %v908_v56 = vadd.f32 %v907_v42, %v878_v47  ;;  %v1055_v42 = vpop.permute.xlu1 %1054 }
 0x327   : > { %v900_v3 = vrot.slane %v899_v62, 4 }
 0x328   : > { %v909_v28 = vrot.slane %v908_v56, 4 }
 0x329   : > { %v901_v55 = vadd.f32 %v900_v3, %v899_v62 }
 0x32a   : > { %v910_v63 = vadd.f32 %v909_v28, %v908_v56 }
 0x32b   : > { %v902_v57 = vrot.slane %v901_v55, 2 }
 0x32c   : > { %v911_v2 = vrot.slane %v910_v63, 2 }
 0x32d   : > { %v903_v8 = vadd.f32 %v902_v57, %v901_v55 }
 0x32e   : > { %v912_v14 = vadd.f32 %v911_v2, %v910_v63 }
 0x32f   : > { %v1258_v20 = vpop.eup %1257  ;;  %v904_v37 = vrot.slane %v903_v8, 1 }
 0x330   : > { %v1260_v9 = vpop.eup %1259  ;;  %v931_v15 = vmul.f32 %v1258_v20, %v1619_v59  ;;  %v935_v16 = vmul.f32 %v1258_v20, %v1625_v32  ;;  %v913_v19 = vrot.slane %v912_v14, 1  ;;  %v923_v24 = vmul.f32 %v1258_v20, %v1603_v35 }
 0x331   : > { %v936_v25 = vmul.f32 %v1260_v9, %v1629_v22  ;;  %v905_v27 = vadd.f32 %v904_v37, %v903_v8  ;;  %v924_v26 = vmul.f32 %v1260_v9, %v1605_v40  ;;  %v928_v31 = vmul.f32 %v1260_v9, %v1609_v46 }
 0x332   : > { %v944_v34 = vpack.c.bf16 %v935_v16, %v931_v15  ;;  %v914_v38 = vadd.f32 %v913_v19, %v912_v14  ;;  %v927_v39 = vmul.f32 %v1258_v20, %v1607_v44  ;;  %v932_v45 = vmul.f32 %v1260_v9, %v1621_v53 }
 0x333   : > { %v917_v48 = vmax.f32 %v905_v27, 1e-24  ;;  %v941_v59 = vpack.c.bf16 %v928_v31, %v924_v26 }
 0x334   : > { %v918_v50 = vmax.f32 %v914_v38, 1e-24  ;;  %v940_v32 = vpack.c.bf16 %v927_v39, %v923_v24  ;;  %v945_v51 = vpack.c.bf16 %v936_v25, %v932_v45 }
 0x335   : > { %1261 = vrsqrt.f32 %v917_v48  ;;  %951 = vmatprep.subr.bf16.mxu0 %v941_v59 }
 0x336   : > { %1263 = vrsqrt.f32 %v918_v50  ;;  %952 = vmatpush1.bf16.msra.mxu0 %v940_v32 }
 0x337   : > { %953 = vmatprep.subr.bf16.mxu0 %v945_v51 }
 0x33a   : > { %954 = vmatpush1.bf16.msra.mxu0 %v944_v34 }
 0x33d   : > { %1170 = vmatmul.mubr.msk.bf16.vlgmr.msra.gmra.mrb[16].mxu0 %vm664_vm2, %v1601_v30 }
 0x33e   : > { %1026 = vmatprep.mubr.bf16.mxu0 %v1329_v0 }
 0x33f   : > { %v1262_v35 = vpop.eup %1261 }
 0x340   : > { %v1264_v40 = vpop.eup %1263  ;;  %v933_v44 = vmul.f32 %v1262_v35, %v855_v43  ;;  %v937_v46 = vmul.f32 %v1262_v35, %v859_v58  ;;  %v925_v53 = vmul.f32 %v1262_v35, %v1635_v60  ;;  %v929_v22 = vmul.f32 %v1262_v35, %v1639_v13 }
 0x341   : > { %v938_v52 = vmul.f32 %v1264_v40, %v861_v21  ;;  %v926_v4 = vmul.f32 %v1264_v40, %v1637_v1  ;;  %v930_v29 = vmul.f32 %v1264_v40, %v1641_v23  ;;  %v934_v61 = vmul.f32 %v1264_v40, %v1651_v49  ;;  %v1050_v23 = vpop.permute.xlu0 %1049 }
 0x342   : > { %v946_v54 = vpack.c.bf16 %v937_v46, %v933_v44  ;;  %v942_v41 = vpack.c.bf16 %v929_v22, %v925_v53 }
 0x343   : > { %v943_v0 = vpack.c.bf16 %v930_v29, %v926_v4  ;;  %v947_v33 = vpack.c.bf16 %v938_v52, %v934_v61 }
 0x345   : > { %994 = vmatprep.subr.bf16.mxu0 %v943_v0 }
 0x346   : > { %995 = vmatpush1.bf16.msra.mxu0 %v942_v41 }
 0x347   : > { %996 = vmatprep.subr.bf16.mxu0 %v947_v33 }
 0x34a   : > { %997 = vmatpush1.bf16.msra.mxu0 %v946_v54 }
 0x34d   : > { %1171 = vmatmul.mubr.msk.bf16.vlgmr.msra.gmra.mrb[20].mxu0 %vm664_vm2, %v1601_v30 }
 0x410   : > { %v985_v60 = vpop.f32.mrb[16].mxu0 }
 0x411   : > { %v1037_v1 = vadd.f32 %v985_v60, %v1467_v11  ;;  %v987_v13 = vpop.f32.mrb[17].mxu0 }
 0x412   : > { %v1038_v43 = vadd.f32 %v987_v13, %v1452_v5  ;;  %v989_v49 = vpop.f32.mrb[18].mxu0 }
 0x413   : > { %v1057_v58 = vadd.f32 %v1050_v23, %v1037_v1  ;;  %v1041_v21 = vadd.f32 %v989_v49, %v1469_v12  ;;  %v991_v36 = vpop.f32.mrb[19].mxu0 }
 0x414   : > { %v1058_v47 = vadd.f32 %v1050_v23, %v1038_v43  ;;  %v1042_v30 = vadd.f32 %v991_v36, %v1454_v6 }
 0x415   : > { %1065 = vst [vmem:[%s299_s28] sm:$0xff] %v1057_v58  ;;  %v1061_v62 = vadd.f32 %v1055_v42, %v1041_v21 }
 0x416   : > { %1066 = vst [vmem:[%s299_s28 + $0x8] sm:$0xff] %v1058_v47  ;;  %v1062_v56 = vadd.f32 %v1055_v42, %v1042_v30 }
 0x417   : > { %1069 = vst [vmem:[%s299_s28 + $0x20] sm:$0xff] %v1061_v62 }
 0x418   : > { %1070 = vst [vmem:[%s299_s28 + $0x28] sm:$0xff] %v1062_v56 }
 0x420   : > { %v1028_v11 = vpop.f32.mrb[20].mxu0 }
 0x421   : > { %v1039_v5 = vadd.f32 %v1028_v11, %v1485_v17  ;;  %v1030_v3 = vpop.f32.mrb[21].mxu0 }
 0x422   : > { %v1040_v28 = vadd.f32 %v1030_v3, %v1456_v7  ;;  %v1032_v12 = vpop.f32.mrb[22].mxu0 }
 0x423   : > { %v1059_v55 = vadd.f32 %v1050_v23, %v1039_v5  ;;  %v1043_v6 = vadd.f32 %v1032_v12, %v1487_v18  ;;  %v1034_v63 = vpop.f32.mrb[23].mxu0 }
 0x424   : > { %v1060_v57 = vadd.f32 %v1050_v23, %v1040_v28  ;;  %v1044_v2 = vadd.f32 %v1034_v63, %v1465_v10 }
 0x425   : > { %1067 = vst [vmem:[%s299_s28 + $0x10] sm:$0xff] %v1059_v55  ;;  %v1063_v8 = vadd.f32 %v1055_v42, %v1043_v6 }
 0x426   : > { %1068 = vst [vmem:[%s299_s28 + $0x18] sm:$0xff] %v1060_v57  ;;  %v1064_v7 = vadd.f32 %v1055_v42, %v1044_v2 }
 0x427   : > { %1071 = vst [vmem:[%s299_s28 + $0x30] sm:$0xff] %v1063_v8 }
 0x428   : > { %1072 = vst [vmem:[%s299_s28 + $0x38] sm:$0xff] %v1064_v7 }
 0x429   : > { %1278 = shalt.err (!%p1275_p3)
}
 0x42a   : > { %s1279_s24 = scalar_lea.hbm %s1688_s19, 1024  ;;  %s1283_s27 = scalar_lea.hbm %s1743_s8, 2048 }
 0x42b   : > { %p1280_p4 = scmp.ne.s32.totalorder %s1688_s19, %s1279_s24  ;;  %p1284_p9 = scmp.lt.u32.totalorder %s1688_s19, %s1743_s8 }
 0x42c   : > { %p1285_p10 = scmp.lt.u32.totalorder %s1283_s27, %s1279_s24  ;;  %p1287_p12 = scmp.lt.u32.totalorder %s1279_s24, %s1688_s19 }
 0x42d   : > { %p1281_p7 = pnand %p1280_p4, %p1421_p5 }
 0x42e   : > { %p1286_p11 = por %p1285_p10, %p1284_p9 }
 0x42f   : > { %p1282_p8 = pneg %p1281_p7 }
 0x430   : > { %p1288_p13 = por %p1287_p12, %p1286_p11 }
 0x432   : > { %p1289_p0 = pnand %p1288_p13, %p1282_p8 }
 0x434   : > { %1292 = shalt.err (!%p1289_p0)
}
 0x435   : > { %s1333_s14 = smov 512   ;;  %s1334_s18 = smov 32  }
 0x436   : > { %1198 = dma.vmem_to_hbm [thread:$0]  (%p1421_p5), %s1690_s13, 1024, %s1688_s19, %s1694_s7, %s1333_s14, %s1333_s14, %s1334_s18  }
 0x437 PF: > { %p1204_p1 = scmp.ge.s32.totalorder %s1327_s10, 2  ;;  %s1102_s20 = sand.u32 1, %s1315_s29  }
 0x438   : > { %s1103_s21 = scalar_lea.sflag [#allocation4], %s1102_s20 }
 0x439   : > { %p1201_p2 = pnand %p1204_p1, %p1425_p6 }
 0x43b   : > { %1310 = dma.done.wait (!%p1201_p2), %s1103_s21, 1024  }
 0x43c   : > { %1312 = vsyncadd (!%p1201_p2), %s1103_s21, 4294966272  ;;  %p19_p3 = scmp.ge.s32.totalorder %s1408_s12, 4   ;;  %s1746_s29 = smov %s1319_s30 }
 0x43d   : > { %s1747_s30 = smov %s1323_s9  ;;  %s1748_s9 = smov %s1419_s15 }
 0x43e   : > { %s1749_s10 = smov %s1408_s12  ;;  %21 = sbr.rel (!%p19_p3) target bundleno = 5 (0x5), region = 87 }
 0x445   :  { %1108 = vsyncpa [#allocation4], 1 }
 0x446   :  { %1110 = vsyncpa [#allocation4 + $0x1], 1 }

</bundles_post_ra>
